<compile_context>
chip_gen: v5e
topology: v5e:2x2
jax: 0.10.0
libtpu: 0.0.40
codegen_flags: <defaults>
</compile_context>

<pallas_src>
import functools

import jax
import jax.numpy as jnp
import numpy as np
from jax.experimental import pallas as pl
from jax.experimental.pallas import tpu as pltpu


def resnet_block_kernel(x_ref, w1_ref, b1_ref, w2_ref, b2_ref, out_ref,
                        taps_ref, *, H, C):
    # x_ref   : (R, W*C)        lane-dense view of ipb whole images (f32)
    # w1/w2   : (9*W*C, W*C)    block-diagonal 3x3 conv weights, BN scale
    #                           folded into columns, bf16
    # b1/b2   : (1, W*C)        folded BN shift (conv bias folded in), f32
    # out_ref : (R, W*C)        f32
    # taps_ref: (R, 9*W*C)      bf16 VMEM scratch (im2col LHS)
    R, WC = x_ref.shape
    W = WC // C

    # Hoisted iota + boundary masks: computed once, reused by both convs.
    lane = jax.lax.broadcasted_iota(jnp.int32, (R, WC), 1)
    ypos = jax.lax.broadcasted_iota(jnp.int32, (R, WC), 0) % H
    m_dx_neg = lane >= C                # valid lanes for dx = -1
    m_dx_pos = lane < (W - 1) * C       # valid lanes for dx = +1
    m_dy_neg = ypos >= 1                # valid rows  for dy = -1
    m_dy_pos = ypos < (H - 1)           # valid rows  for dy = +1

    def write_taps(a):
        """Write the 9 shifted-and-masked views of `a` into taps_ref (bf16).

        Tap k = (dy+1)*3 + (dx+1) lands at lanes [k*WC, (k+1)*WC) -- matching
        the (ky, kx) stacking order of the expanded weights.  All slice stores
        are 128-lane aligned (unmasked vst).
        """
        # dx (width) shifts: lane rolls (XLU) + lane masks.
        x_shifted = []
        for dx, m in ((-1, m_dx_neg), (0, None), (1, m_dx_pos)):
            s = a
            if dx != 0:
                s = pltpu.roll(s, (-dx * C) % WC, axis=1)
                s = jnp.where(m, s, 0.0)
            x_shifted.append(s)
        # dy (height) shifts: sublane rolls + row masks (also kill any
        # cross-image leakage since rows of different images are adjacent).
        k = 0
        for dy, m in ((-1, m_dy_neg), (0, None), (1, m_dy_pos)):
            for s in x_shifted:          # dx = -1, 0, 1
                t = s
                if dy != 0:
                    t = pltpu.roll(t, (-dy) % R, axis=0)
                    t = jnp.where(m, t, 0.0)
                taps_ref[:, k * WC:(k + 1) * WC] = t.astype(taps_ref.dtype)
                k += 1

    x = x_ref[...]

    # conv1 (3x3, stride 1, pad 1) + folded BN (scale in weights) + ReLU.
    write_taps(x)
    h1 = jnp.dot(taps_ref[...], w1_ref[...],
                 preferred_element_type=jnp.float32)
    h1 = jnp.maximum(h1 + b1_ref[...], 0.0)

    # conv2 (3x3, stride 1, pad 1) + folded BN shift.
    write_taps(h1)
    h2 = jnp.dot(taps_ref[...], w2_ref[...],
                 preferred_element_type=jnp.float32)
    h2 = h2 + b2_ref[...]

    # identity residual + final ReLU (lane-dense, unmasked store).
    out_ref[...] = jnp.maximum(h2 + x, 0.0)


def _expand_weights(w_hwio, W):
    """(3,3,C,C) HWIO -> (9*W*C, W*C) block-diagonal, stacked over taps."""
    C = w_hwio.shape[2]
    eye = jnp.eye(W, dtype=jnp.float32)
    blocks = []
    for ky in range(3):                 # dy = ky - 1  (matches kernel order)
        for kx in range(3):             # dx = kx - 1
            blocks.append(jnp.kron(eye, w_hwio[ky, kx].astype(jnp.float32)))
    return jnp.concatenate(blocks, axis=0)


def _fold_bn(conv_bias, gamma, beta, running_mean, running_var, eps=1e-5):
    scale = gamma / jnp.sqrt(running_var + eps)
    shift = beta + (conv_bias - running_mean) * scale
    return scale, shift


def prepare_params(w1, bias1, g1, be1, m1, v1,
                   w2, bias2, g2, be2, m2, v2, W, eps=1e-5):
    """One-time host-side prep: expand weights, fold BN scale, cast to bf16."""
    s1, b1 = _fold_bn(bias1, g1, be1, m1, v1, eps)
    s2, b2 = _fold_bn(bias2, g2, be2, m2, v2, eps)
    # Per-output-channel BN scale commutes with the matmul -> fold into columns.
    w1_big = (_expand_weights(w1, W) * jnp.tile(s1, W)[None, :]).astype(jnp.bfloat16)
    w2_big = (_expand_weights(w2, W) * jnp.tile(s2, W)[None, :]).astype(jnp.bfloat16)
    b1l = jnp.tile(b1, W)[None, :].astype(jnp.float32)
    b2l = jnp.tile(b2, W)[None, :].astype(jnp.float32)
    return w1_big, b1l, w2_big, b2l


@jax.jit
def resnet_block(x_nhwc, w1_big, b1l, w2_big, b2l):
    """x_nhwc: (N,H,W,C) f32; w*_big/b*l from prepare_params."""
    N, H, W, C = x_nhwc.shape
    WC, NH = W * C, N * H
    assert w1_big.shape == (9 * WC, WC) and w2_big.shape == (9 * WC, WC)
    assert WC % 128 == 0, "lane-dense layout needs W*C % 128 == 0"

    # Image-aligned row blocks; prefer 2 blocks (v7x has 2 TCs) when the batch
    # splits evenly, otherwise one step (per-grid-step overhead ~0.35 us).
    ipb = N // 2 if (N >= 2 and N % 2 == 0) else N
    R = ipb * H
    assert R % 8 == 0, "block rows must be a multiple of 8"
    num_blocks = NH // R

    x2d = x_nhwc.reshape(NH, WC)                      # free (contiguous) view
    kernel = functools.partial(resnet_block_kernel, H=H, C=C)

    out2d = pl.pallas_call(
        kernel,
        out_shape=jax.ShapeDtypeStruct((NH, WC), jnp.float32),
        grid_spec=pltpu.PrefetchScalarGridSpec(
            num_scalar_prefetch=0,
            grid=(num_blocks,),
            in_specs=[
                pl.BlockSpec((R, WC), lambda i: (i, 0)),
                pl.BlockSpec((9 * WC, WC), lambda i: (0, 0)),
                pl.BlockSpec((1, WC), lambda i: (0, 0)),
                pl.BlockSpec((9 * WC, WC), lambda i: (0, 0)),
                pl.BlockSpec((1, WC), lambda i: (0, 0)),
            ],
            out_specs=pl.BlockSpec((R, WC), lambda i: (i, 0)),
            scratch_shapes=[pltpu.VMEM((R, 9 * WC), jnp.bfloat16)],
        ),
        compiler_params=pltpu.CompilerParams(
            dimension_semantics=("parallel",)),
        # x is fully consumed into the residual before the single final store,
        # so its HBM buffer can be reused for the output.
        input_output_aliases={0: 0},
    )(x2d, w1_big, b1l, w2_big, b2l)

    return out2d.reshape(N, H, W, C)


def _ref_block(x, w1, bias1, g1, be1, m1, v1, w2, bias2, g2, be2, m2, v2,
               eps=1e-5):
    """Pure-JAX f32 reference (eval-mode BN), NHWC / HWIO."""
    dn = ("NHWC", "HWIO", "NHWC")
    c1 = jax.lax.conv_general_dilated(x, w1, (1, 1), ((1, 1), (1, 1)),
                                      dimension_numbers=dn) + bias1
    c1 = (c1 - m1) / jnp.sqrt(v1 + eps) * g1 + be1
    c1 = jnp.maximum(c1, 0.0)
    c2 = jax.lax.conv_general_dilated(c1, w2, (1, 1), ((1, 1), (1, 1)),
                                      dimension_numbers=dn) + bias2
    c2 = (c2 - m2) / jnp.sqrt(v2 + eps) * g2 + be2
    return jnp.maximum(c2 + x, 0.0)


if __name__ == "__main__":
    # Small shapes consistent with the module; W*C = 128 makes lanes dense.
    N, C, H, W = 2, 8, 16, 16
    key = jax.random.PRNGKey(0)
    keys = jax.random.split(key, 12)

    # Input as the PyTorch module would see it: NCHW -> NHWC at the boundary.
    x_nchw = jax.random.normal(keys[0], (N, C, H, W), jnp.float32)
    x_nhwc = jnp.transpose(x_nchw, (0, 2, 3, 1))

    # Deterministic parameters (HWIO conv weights, per-channel BN params).
    w1 = 0.1 * jax.random.normal(keys[1], (3, 3, C, C), jnp.float32)
    bias1 = 0.1 * jax.random.normal(keys[2], (C,), jnp.float32)
    g1 = 1.0 + 0.1 * jax.random.normal(keys[3], (C,), jnp.float32)
    be1 = 0.1 * jax.random.normal(keys[4], (C,), jnp.float32)
    m1 = 0.1 * jax.random.normal(keys[5], (C,), jnp.float32)
    v1 = 1.0 + 0.1 * jax.random.uniform(keys[6], (C,), jnp.float32)

    w2 = 0.1 * jax.random.normal(keys[7], (3, 3, C, C), jnp.float32)
    bias2 = 0.1 * jax.random.normal(keys[8], (C,), jnp.float32)
    g2 = 1.0 + 0.1 * jax.random.normal(keys[9], (C,), jnp.float32)
    be2 = 0.1 * jax.random.normal(keys[10], (C,), jnp.float32)
    m2 = 0.1 * jax.random.normal(keys[11], (C,), jnp.float32)
    v2 = 1.0 + 0.1 * jax.random.uniform(keys[0], (C,), jnp.float32)

    # One-time weight expansion / BN-scale fold / bf16 cast (cached per model).
    w1_big, b1l, w2_big, b2l = prepare_params(
        w1, bias1, g1, be1, m1, v1, w2, bias2, g2, be2, m2, v2, W)
    w1_big, b1l, w2_big, b2l = jax.block_until_ready((w1_big, b1l, w2_big, b2l))

    out = resnet_block(x_nhwc, w1_big, b1l, w2_big, b2l)
    out = jax.block_until_ready(out)

    ref = _ref_block(x_nhwc, w1, bias1, g1, be1, m1, v1,
                     w2, bias2, g2, be2, m2, v2)
    # bf16 MXU operands (f32 accumulation) -> loosened tolerance vs f32 ref.
    np.testing.assert_allclose(np.asarray(out), np.asarray(ref),
                               atol=5e-2, rtol=5e-2)

    print("KERNEL_OK")
</pallas_src>

<mosaic_0001>
module attributes {stable_mosaic.version = 11 : i64} {
  func.func @resnet_block_kernel(%arg0: i32, %arg1: memref<16x128xf32, #tpu.memory_space<vmem>>, %arg2: memref<1152x128xbf16, #tpu.memory_space<vmem>>, %arg3: memref<1x128xf32, #tpu.memory_space<vmem>>, %arg4: memref<1152x128xbf16, #tpu.memory_space<vmem>>, %arg5: memref<1x128xf32, #tpu.memory_space<vmem>>, %arg6: memref<16x128xf32, #tpu.memory_space<vmem>>, %arg7: memref<16x1152xbf16, #tpu.memory_space<vmem>>) attributes {dimension_semantics = [#tpu.dimension_semantics<parallel>], iteration_bounds = array<i64: 2>, scalar_prefetch = 0 : i64, scratch_operands = 1 : i64, tpu.core_type = #tpu.core_type<tc>, window_params = [{transform_indices = @transform_0, window_bounds = array<i64: 16, 128>}, {pipeline_mode = #tpu.pipeline_mode<synchronous>, transform_indices = @transform_1, window_bounds = array<i64: 1152, 128>}, {pipeline_mode = #tpu.pipeline_mode<synchronous>, transform_indices = @transform_2, window_bounds = array<i64: 1, 128>}, {pipeline_mode = #tpu.pipeline_mode<synchronous>, transform_indices = @transform_3, window_bounds = array<i64: 1152, 128>}, {pipeline_mode = #tpu.pipeline_mode<synchronous>, transform_indices = @transform_4, window_bounds = array<i64: 1, 128>}, {transform_indices = @transform_5, window_bounds = array<i64: 16, 128>}]} {
    %0 = tpu.iota {dimensions = array<i32: 1>} : vector<16x128xi32>
    %1 = tpu.iota {dimensions = array<i32: 0>} : vector<16x128xi32>
    %c16_i32 = arith.constant 16 : i32
    %c0_i32 = arith.constant 0 : i32
    %2 = arith.cmpi eq, %c16_i32, %c0_i32 : i32
    %c1_i32 = arith.constant 1 : i32
    %3 = arith.select %2, %c1_i32, %c16_i32 : i32
    %4 = vector.broadcast %3 : i32 to vector<16x128xi32>
    %5 = arith.remsi %1, %4 : vector<16x128xi32>
    %c0_i32_0 = arith.constant 0 : i32
    %6 = vector.broadcast %c0_i32_0 : i32 to vector<16x128xi32>
    %7 = arith.cmpi ne, %5, %6 : vector<16x128xi32>
    %c0_i32_1 = arith.constant 0 : i32
    %8 = vector.broadcast %c0_i32_1 : i32 to vector<16x128xi32>
    %9 = arith.cmpi slt, %5, %8 : vector<16x128xi32>
    %c0_i32_2 = arith.constant 0 : i32
    %10 = arith.cmpi slt, %3, %c0_i32_2 : i32
    %11 = vector.broadcast %10 : i1 to vector<16x128xi1>
    %12 = vector.broadcast %11 : vector<16x128xi1> to vector<16x128xi1>
    %13 = arith.xori %9, %12 : vector<16x128xi1>
    %14 = arith.andi %13, %7 : vector<16x128xi1>
    %15 = vector.broadcast %3 : i32 to vector<16x128xi32>
    %16 = arith.addi %5, %15 : vector<16x128xi32>
    %17 = arith.select %14, %16, %5 : vector<16x128xi1>, vector<16x128xi32>
    %c8_i32 = arith.constant 8 : i32
    %18 = vector.broadcast %c8_i32 : i32 to vector<16x128xi32>
    %19 = arith.cmpi sge, %0, %18 : vector<16x128xi32>
    %c120_i32 = arith.constant 120 : i32
    %20 = vector.broadcast %c120_i32 : i32 to vector<16x128xi32>
    %21 = arith.cmpi slt, %0, %20 : vector<16x128xi32>
    %c1_i32_3 = arith.constant 1 : i32
    %22 = vector.broadcast %c1_i32_3 : i32 to vector<16x128xi32>
    %23 = arith.cmpi sge, %17, %22 : vector<16x128xi32>
    %c15_i32 = arith.constant 15 : i32
    %24 = vector.broadcast %c15_i32 : i32 to vector<16x128xi32>
    %25 = arith.cmpi slt, %17, %24 : vector<16x128xi32>
    %c0 = arith.constant 0 : index
    %c0_4 = arith.constant 0 : index
    %26 = vector.load %arg1[%c0, %c0_4] : memref<16x128xf32, #tpu.memory_space<vmem>>, vector<16x128xf32>
    %c8_i32_5 = arith.constant 8 : i32
    %27 = tpu.dynamic_rotate %26 by %c8_i32_5 dim 1 : vector<16x128xf32>, i32 -> vector<16x128xf32>
    %cst = arith.constant 0.000000e+00 : f32
    %28 = vector.broadcast %cst : f32 to vector<16x128xf32>
    %29 = arith.select %19, %27, %28 : vector<16x128xi1>, vector<16x128xf32>
    %c120_i32_6 = arith.constant 120 : i32
    %30 = tpu.dynamic_rotate %26 by %c120_i32_6 dim 1 : vector<16x128xf32>, i32 -> vector<16x128xf32>
    %cst_7 = arith.constant 0.000000e+00 : f32
    %31 = vector.broadcast %cst_7 : f32 to vector<16x128xf32>
    %32 = arith.select %21, %30, %31 : vector<16x128xi1>, vector<16x128xf32>
    %c1_i32_8 = arith.constant 1 : i32
    %33 = tpu.dynamic_rotate %29 by %c1_i32_8 dim 0 : vector<16x128xf32>, i32 -> vector<16x128xf32>
    %cst_9 = arith.constant 0.000000e+00 : f32
    %34 = vector.broadcast %cst_9 : f32 to vector<16x128xf32>
    %35 = arith.select %23, %33, %34 : vector<16x128xi1>, vector<16x128xf32>
    %36 = arith.truncf %35 : vector<16x128xf32> to vector<16x128xbf16>
    %c0_10 = arith.constant 0 : index
    %c0_11 = arith.constant 0 : index
    %37 = vector.load %arg7[%c0_10, %c0_11] : memref<16x1152xbf16, #tpu.memory_space<vmem>>, vector<16x128xbf16>
    tpu.vector_store %arg7[%c0_10, %c0_11], %36 {strides = array<i32>} : memref<16x1152xbf16, #tpu.memory_space<vmem>>, vector<16x128xbf16>,
    %c1_i32_12 = arith.constant 1 : i32
    %38 = tpu.dynamic_rotate %26 by %c1_i32_12 dim 0 : vector<16x128xf32>, i32 -> vector<16x128xf32>
    %cst_13 = arith.constant 0.000000e+00 : f32
    %39 = vector.broadcast %cst_13 : f32 to vector<16x128xf32>
    %40 = arith.select %23, %38, %39 : vector<16x128xi1>, vector<16x128xf32>
    %41 = arith.truncf %40 : vector<16x128xf32> to vector<16x128xbf16>
    %c0_14 = arith.constant 0 : index
    %c128 = arith.constant 128 : index
    %42 = vector.load %arg7[%c0_14, %c128] : memref<16x1152xbf16, #tpu.memory_space<vmem>>, vector<16x128xbf16>
    tpu.vector_store %arg7[%c0_14, %c128], %41 {strides = array<i32>} : memref<16x1152xbf16, #tpu.memory_space<vmem>>, vector<16x128xbf16>,
    %c1_i32_15 = arith.constant 1 : i32
    %43 = tpu.dynamic_rotate %32 by %c1_i32_15 dim 0 : vector<16x128xf32>, i32 -> vector<16x128xf32>
    %cst_16 = arith.constant 0.000000e+00 : f32
    %44 = vector.broadcast %cst_16 : f32 to vector<16x128xf32>
    %45 = arith.select %23, %43, %44 : vector<16x128xi1>, vector<16x128xf32>
    %46 = arith.truncf %45 : vector<16x128xf32> to vector<16x128xbf16>
    %c0_17 = arith.constant 0 : index
    %c256 = arith.constant 256 : index
    %47 = vector.load %arg7[%c0_17, %c256] : memref<16x1152xbf16, #tpu.memory_space<vmem>>, vector<16x128xbf16>
    tpu.vector_store %arg7[%c0_17, %c256], %46 {strides = array<i32>} : memref<16x1152xbf16, #tpu.memory_space<vmem>>, vector<16x128xbf16>,
    %48 = arith.truncf %29 : vector<16x128xf32> to vector<16x128xbf16>
    %c0_18 = arith.constant 0 : index
    %c384 = arith.constant 384 : index
    %49 = vector.load %arg7[%c0_18, %c384] : memref<16x1152xbf16, #tpu.memory_space<vmem>>, vector<16x128xbf16>
    tpu.vector_store %arg7[%c0_18, %c384], %48 {strides = array<i32>} : memref<16x1152xbf16, #tpu.memory_space<vmem>>, vector<16x128xbf16>,
    %50 = arith.truncf %26 : vector<16x128xf32> to vector<16x128xbf16>
    %c0_19 = arith.constant 0 : index
    %c512 = arith.constant 512 : index
    %51 = vector.load %arg7[%c0_19, %c512] : memref<16x1152xbf16, #tpu.memory_space<vmem>>, vector<16x128xbf16>
    tpu.vector_store %arg7[%c0_19, %c512], %50 {strides = array<i32>} : memref<16x1152xbf16, #tpu.memory_space<vmem>>, vector<16x128xbf16>,
    %52 = arith.truncf %32 : vector<16x128xf32> to vector<16x128xbf16>
    %c0_20 = arith.constant 0 : index
    %c640 = arith.constant 640 : index
    %53 = vector.load %arg7[%c0_20, %c640] : memref<16x1152xbf16, #tpu.memory_space<vmem>>, vector<16x128xbf16>
    tpu.vector_store %arg7[%c0_20, %c640], %52 {strides = array<i32>} : memref<16x1152xbf16, #tpu.memory_space<vmem>>, vector<16x128xbf16>,
    %c15_i32_21 = arith.constant 15 : i32
    %54 = tpu.dynamic_rotate %29 by %c15_i32_21 dim 0 : vector<16x128xf32>, i32 -> vector<16x128xf32>
    %cst_22 = arith.constant 0.000000e+00 : f32
    %55 = vector.broadcast %cst_22 : f32 to vector<16x128xf32>
    %56 = arith.select %25, %54, %55 : vector<16x128xi1>, vector<16x128xf32>
    %57 = arith.truncf %56 : vector<16x128xf32> to vector<16x128xbf16>
    %c0_23 = arith.constant 0 : index
    %c768 = arith.constant 768 : index
    %58 = vector.load %arg7[%c0_23, %c768] : memref<16x1152xbf16, #tpu.memory_space<vmem>>, vector<16x128xbf16>
    tpu.vector_store %arg7[%c0_23, %c768], %57 {strides = array<i32>} : memref<16x1152xbf16, #tpu.memory_space<vmem>>, vector<16x128xbf16>,
    %c15_i32_24 = arith.constant 15 : i32
    %59 = tpu.dynamic_rotate %26 by %c15_i32_24 dim 0 : vector<16x128xf32>, i32 -> vector<16x128xf32>
    %cst_25 = arith.constant 0.000000e+00 : f32
    %60 = vector.broadcast %cst_25 : f32 to vector<16x128xf32>
    %61 = arith.select %25, %59, %60 : vector<16x128xi1>, vector<16x128xf32>
    %62 = arith.truncf %61 : vector<16x128xf32> to vector<16x128xbf16>
    %c0_26 = arith.constant 0 : index
    %c896 = arith.constant 896 : index
    %63 = vector.load %arg7[%c0_26, %c896] : memref<16x1152xbf16, #tpu.memory_space<vmem>>, vector<16x128xbf16>
    tpu.vector_store %arg7[%c0_26, %c896], %62 {strides = array<i32>} : memref<16x1152xbf16, #tpu.memory_space<vmem>>, vector<16x128xbf16>,
    %c15_i32_27 = arith.constant 15 : i32
    %64 = tpu.dynamic_rotate %32 by %c15_i32_27 dim 0 : vector<16x128xf32>, i32 -> vector<16x128xf32>
    %cst_28 = arith.constant 0.000000e+00 : f32
    %65 = vector.broadcast %cst_28 : f32 to vector<16x128xf32>
    %66 = arith.select %25, %64, %65 : vector<16x128xi1>, vector<16x128xf32>
    %67 = arith.truncf %66 : vector<16x128xf32> to vector<16x128xbf16>
    %c0_29 = arith.constant 0 : index
    %c1024 = arith.constant 1024 : index
    %68 = vector.load %arg7[%c0_29, %c1024] : memref<16x1152xbf16, #tpu.memory_space<vmem>>, vector<16x128xbf16>
    tpu.vector_store %arg7[%c0_29, %c1024], %67 {strides = array<i32>} : memref<16x1152xbf16, #tpu.memory_space<vmem>>, vector<16x128xbf16>,
    %c0_30 = arith.constant 0 : index
    %c0_31 = arith.constant 0 : index
    %69 = vector.load %arg7[%c0_30, %c0_31] : memref<16x1152xbf16, #tpu.memory_space<vmem>>, vector<16x1152xbf16>
    %c0_32 = arith.constant 0 : index
    %c0_33 = arith.constant 0 : index
    %70 = vector.load %arg2[%c0_32, %c0_33] : memref<1152x128xbf16, #tpu.memory_space<vmem>>, vector<1152x128xbf16>
    %cst_34 = arith.constant dense<0.000000e+00> : vector<16x128xf32>
    %71 = tpu.matmul %69, %70, %cst_34 {dimension_numbers = #tpu.dot_dimension_numbers<[1], [0], [0], [1], [0, 0, 1, 1], [], []>} : vector<16x1152xbf16>, vector<1152x128xbf16>, vector<16x128xf32> -> vector<16x128xf32>
    %c0_35 = arith.constant 0 : index
    %c0_36 = arith.constant 0 : index
    %72 = vector.load %arg3[%c0_35, %c0_36] : memref<1x128xf32, #tpu.memory_space<vmem>>, vector<1x128xf32>
    %73 = vector.broadcast %72 : vector<1x128xf32> to vector<16x128xf32>
    %74 = arith.addf %71, %73 : vector<16x128xf32>
    %cst_37 = arith.constant 0.000000e+00 : f32
    %75 = vector.broadcast %cst_37 : f32 to vector<16x128xf32>
    %76 = arith.maximumf %74, %75 : vector<16x128xf32>
    %c8_i32_38 = arith.constant 8 : i32
    %77 = tpu.dynamic_rotate %76 by %c8_i32_38 dim 1 : vector<16x128xf32>, i32 -> vector<16x128xf32>
    %cst_39 = arith.constant 0.000000e+00 : f32
    %78 = vector.broadcast %cst_39 : f32 to vector<16x128xf32>
    %79 = arith.select %19, %77, %78 : vector<16x128xi1>, vector<16x128xf32>
    %c120_i32_40 = arith.constant 120 : i32
    %80 = tpu.dynamic_rotate %76 by %c120_i32_40 dim 1 : vector<16x128xf32>, i32 -> vector<16x128xf32>
    %cst_41 = arith.constant 0.000000e+00 : f32
    %81 = vector.broadcast %cst_41 : f32 to vector<16x128xf32>
    %82 = arith.select %21, %80, %81 : vector<16x128xi1>, vector<16x128xf32>
    %c1_i32_42 = arith.constant 1 : i32
    %83 = tpu.dynamic_rotate %79 by %c1_i32_42 dim 0 : vector<16x128xf32>, i32 -> vector<16x128xf32>
    %cst_43 = arith.constant 0.000000e+00 : f32
    %84 = vector.broadcast %cst_43 : f32 to vector<16x128xf32>
    %85 = arith.select %23, %83, %84 : vector<16x128xi1>, vector<16x128xf32>
    %86 = arith.truncf %85 : vector<16x128xf32> to vector<16x128xbf16>
    %c0_44 = arith.constant 0 : index
    %c0_45 = arith.constant 0 : index
    %87 = vector.load %arg7[%c0_44, %c0_45] : memref<16x1152xbf16, #tpu.memory_space<vmem>>, vector<16x128xbf16>
    tpu.vector_store %arg7[%c0_44, %c0_45], %86 {strides = array<i32>} : memref<16x1152xbf16, #tpu.memory_space<vmem>>, vector<16x128xbf16>,
    %c1_i32_46 = arith.constant 1 : i32
    %88 = tpu.dynamic_rotate %76 by %c1_i32_46 dim 0 : vector<16x128xf32>, i32 -> vector<16x128xf32>
    %cst_47 = arith.constant 0.000000e+00 : f32
    %89 = vector.broadcast %cst_47 : f32 to vector<16x128xf32>
    %90 = arith.select %23, %88, %89 : vector<16x128xi1>, vector<16x128xf32>
    %91 = arith.truncf %90 : vector<16x128xf32> to vector<16x128xbf16>
    %c0_48 = arith.constant 0 : index
    %c128_49 = arith.constant 128 : index
    %92 = vector.load %arg7[%c0_48, %c128_49] : memref<16x1152xbf16, #tpu.memory_space<vmem>>, vector<16x128xbf16>
    tpu.vector_store %arg7[%c0_48, %c128_49], %91 {strides = array<i32>} : memref<16x1152xbf16, #tpu.memory_space<vmem>>, vector<16x128xbf16>,
    %c1_i32_50 = arith.constant 1 : i32
    %93 = tpu.dynamic_rotate %82 by %c1_i32_50 dim 0 : vector<16x128xf32>, i32 -> vector<16x128xf32>
    %cst_51 = arith.constant 0.000000e+00 : f32
    %94 = vector.broadcast %cst_51 : f32 to vector<16x128xf32>
    %95 = arith.select %23, %93, %94 : vector<16x128xi1>, vector<16x128xf32>
    %96 = arith.truncf %95 : vector<16x128xf32> to vector<16x128xbf16>
    %c0_52 = arith.constant 0 : index
    %c256_53 = arith.constant 256 : index
    %97 = vector.load %arg7[%c0_52, %c256_53] : memref<16x1152xbf16, #tpu.memory_space<vmem>>, vector<16x128xbf16>
    tpu.vector_store %arg7[%c0_52, %c256_53], %96 {strides = array<i32>} : memref<16x1152xbf16, #tpu.memory_space<vmem>>, vector<16x128xbf16>,
    %98 = arith.truncf %79 : vector<16x128xf32> to vector<16x128xbf16>
    %c0_54 = arith.constant 0 : index
    %c384_55 = arith.constant 384 : index
    %99 = vector.load %arg7[%c0_54, %c384_55] : memref<16x1152xbf16, #tpu.memory_space<vmem>>, vector<16x128xbf16>
    tpu.vector_store %arg7[%c0_54, %c384_55], %98 {strides = array<i32>} : memref<16x1152xbf16, #tpu.memory_space<vmem>>, vector<16x128xbf16>,
    %100 = arith.truncf %76 : vector<16x128xf32> to vector<16x128xbf16>
    %c0_56 = arith.constant 0 : index
    %c512_57 = arith.constant 512 : index
    %101 = vector.load %arg7[%c0_56, %c512_57] : memref<16x1152xbf16, #tpu.memory_space<vmem>>, vector<16x128xbf16>
    tpu.vector_store %arg7[%c0_56, %c512_57], %100 {strides = array<i32>} : memref<16x1152xbf16, #tpu.memory_space<vmem>>, vector<16x128xbf16>,
    %102 = arith.truncf %82 : vector<16x128xf32> to vector<16x128xbf16>
    %c0_58 = arith.constant 0 : index
    %c640_59 = arith.constant 640 : index
    %103 = vector.load %arg7[%c0_58, %c640_59] : memref<16x1152xbf16, #tpu.memory_space<vmem>>, vector<16x128xbf16>
    tpu.vector_store %arg7[%c0_58, %c640_59], %102 {strides = array<i32>} : memref<16x1152xbf16, #tpu.memory_space<vmem>>, vector<16x128xbf16>,
    %c15_i32_60 = arith.constant 15 : i32
    %104 = tpu.dynamic_rotate %79 by %c15_i32_60 dim 0 : vector<16x128xf32>, i32 -> vector<16x128xf32>
    %cst_61 = arith.constant 0.000000e+00 : f32
    %105 = vector.broadcast %cst_61 : f32 to vector<16x128xf32>
    %106 = arith.select %25, %104, %105 : vector<16x128xi1>, vector<16x128xf32>
    %107 = arith.truncf %106 : vector<16x128xf32> to vector<16x128xbf16>
    %c0_62 = arith.constant 0 : index
    %c768_63 = arith.constant 768 : index
    %108 = vector.load %arg7[%c0_62, %c768_63] : memref<16x1152xbf16, #tpu.memory_space<vmem>>, vector<16x128xbf16>
    tpu.vector_store %arg7[%c0_62, %c768_63], %107 {strides = array<i32>} : memref<16x1152xbf16, #tpu.memory_space<vmem>>, vector<16x128xbf16>,
    %c15_i32_64 = arith.constant 15 : i32
    %109 = tpu.dynamic_rotate %76 by %c15_i32_64 dim 0 : vector<16x128xf32>, i32 -> vector<16x128xf32>
    %cst_65 = arith.constant 0.000000e+00 : f32
    %110 = vector.broadcast %cst_65 : f32 to vector<16x128xf32>
    %111 = arith.select %25, %109, %110 : vector<16x128xi1>, vector<16x128xf32>
    %112 = arith.truncf %111 : vector<16x128xf32> to vector<16x128xbf16>
    %c0_66 = arith.constant 0 : index
    %c896_67 = arith.constant 896 : index
    %113 = vector.load %arg7[%c0_66, %c896_67] : memref<16x1152xbf16, #tpu.memory_space<vmem>>, vector<16x128xbf16>
    tpu.vector_store %arg7[%c0_66, %c896_67], %112 {strides = array<i32>} : memref<16x1152xbf16, #tpu.memory_space<vmem>>, vector<16x128xbf16>,
    %c15_i32_68 = arith.constant 15 : i32
    %114 = tpu.dynamic_rotate %82 by %c15_i32_68 dim 0 : vector<16x128xf32>, i32 -> vector<16x128xf32>
    %cst_69 = arith.constant 0.000000e+00 : f32
    %115 = vector.broadcast %cst_69 : f32 to vector<16x128xf32>
    %116 = arith.select %25, %114, %115 : vector<16x128xi1>, vector<16x128xf32>
    %117 = arith.truncf %116 : vector<16x128xf32> to vector<16x128xbf16>
    %c0_70 = arith.constant 0 : index
    %c1024_71 = arith.constant 1024 : index
    %118 = vector.load %arg7[%c0_70, %c1024_71] : memref<16x1152xbf16, #tpu.memory_space<vmem>>, vector<16x128xbf16>
    tpu.vector_store %arg7[%c0_70, %c1024_71], %117 {strides = array<i32>} : memref<16x1152xbf16, #tpu.memory_space<vmem>>, vector<16x128xbf16>,
    %c0_72 = arith.constant 0 : index
    %c0_73 = arith.constant 0 : index
    %119 = vector.load %arg7[%c0_72, %c0_73] : memref<16x1152xbf16, #tpu.memory_space<vmem>>, vector<16x1152xbf16>
    %c0_74 = arith.constant 0 : index
    %c0_75 = arith.constant 0 : index
    %120 = vector.load %arg4[%c0_74, %c0_75] : memref<1152x128xbf16, #tpu.memory_space<vmem>>, vector<1152x128xbf16>
    %cst_76 = arith.constant dense<0.000000e+00> : vector<16x128xf32>
    %121 = tpu.matmul %119, %120, %cst_76 {dimension_numbers = #tpu.dot_dimension_numbers<[1], [0], [0], [1], [0, 0, 1, 1], [], []>} : vector<16x1152xbf16>, vector<1152x128xbf16>, vector<16x128xf32> -> vector<16x128xf32>
    %c0_77 = arith.constant 0 : index
    %c0_78 = arith.constant 0 : index
    %122 = vector.load %arg5[%c0_77, %c0_78] : memref<1x128xf32, #tpu.memory_space<vmem>>, vector<1x128xf32>
    %123 = vector.broadcast %122 : vector<1x128xf32> to vector<16x128xf32>
    %124 = arith.addf %121, %123 : vector<16x128xf32>
    %125 = arith.addf %124, %26 : vector<16x128xf32>
    %cst_79 = arith.constant 0.000000e+00 : f32
    %126 = vector.broadcast %cst_79 : f32 to vector<16x128xf32>
    %127 = arith.maximumf %125, %126 : vector<16x128xf32>
    %c0_80 = arith.constant 0 : index
    %c0_81 = arith.constant 0 : index
    %128 = vector.load %arg6[%c0_80, %c0_81] : memref<16x128xf32, #tpu.memory_space<vmem>>, vector<16x128xf32>
    tpu.vector_store %arg6[%c0_80, %c0_81], %127 {strides = array<i32>} : memref<16x128xf32, #tpu.memory_space<vmem>>, vector<16x128xf32>,
    return
  }
  func.func @transform_0(%arg0: i32) -> (i32, i32) {
    %c0_i32 = arith.constant 0 : i32
    %c0_i32_0 = arith.constant 0 : i32
    return %arg0, %c0_i32 : i32, i32
  }
  func.func @transform_1(%arg0: i32) -> (i32, i32) {
    %c0_i32 = arith.constant 0 : i32
    %c0_i32_0 = arith.constant 0 : i32
    %c0_i32_1 = arith.constant 0 : i32
    return %c0_i32, %c0_i32_0 : i32, i32
  }
  func.func @transform_2(%arg0: i32) -> (i32, i32) {
    %c0_i32 = arith.constant 0 : i32
    %c0_i32_0 = arith.constant 0 : i32
    %c0_i32_1 = arith.constant 0 : i32
    return %c0_i32, %c0_i32_0 : i32, i32
  }
  func.func @transform_3(%arg0: i32) -> (i32, i32) {
    %c0_i32 = arith.constant 0 : i32
    %c0_i32_0 = arith.constant 0 : i32
    %c0_i32_1 = arith.constant 0 : i32
    return %c0_i32, %c0_i32_0 : i32, i32
  }
  func.func @transform_4(%arg0: i32) -> (i32, i32) {
    %c0_i32 = arith.constant 0 : i32
    %c0_i32_0 = arith.constant 0 : i32
    %c0_i32_1 = arith.constant 0 : i32
    return %c0_i32, %c0_i32_0 : i32, i32
  }
  func.func @transform_5(%arg0: i32) -> (i32, i32) {
    %c0_i32 = arith.constant 0 : i32
    %c0_i32_0 = arith.constant 0 : i32
    return %arg0, %c0_i32 : i32, i32
  }
}

</mosaic_0001>

<bundles_post_ra>
// kernel: resnet_block.1
= control target key start
LH: loop header
LB: loop body
LE: loop exit
PB: predicated region body
PF: predicated region fallthrough
CT: control target
= control target key end

     0   :  { %10 = vsyncpa [#allocation4], 0  ;;  %s3034_s18 = smov 0   ;;  %s3429_s0 = inlined_call_operand.vmem [shape: f32[32,128], index: 0, kind: input, shape index: {}, may-alias: {0,5}]   ;;  %s3430_s1 = inlined_call_operand.vmem [shape: bf16[1152,128], index: 1, kind: input, shape index: {}]   ;;  %s3431_s2 = inlined_call_operand.vmem [shape: f32[1,128], index: 2, kind: input, shape index: {}]   ;;  %s3432_s3 = inlined_call_operand.hbm [shape: bf16[1152,128], index: 3, kind: input, shape index: {}]   ;;  %s3433_s4 = inlined_call_operand.vmem [shape: f32[1,128], index: 4, kind: input, shape index: {}]   ;;  %s3434_s5 = inlined_call_operand.vmem [shape: f32[32,128], index: 5, kind: output, shape index: {}, may-alias: {0,5}]  }
   0x1 LB: > { %s174_s21 = sshll.u32 %s3432_s3, 4  ;;  %s2052_s22 = sadd.s32 4294967295, %s2997_s18   ;;  %s2997_s18 = sphi %s3034_s18, %s16_s18   ;;  %s175_s21 = int_to_ptr.hbm [resolvable:$true] %s174_s21 }
   0x2   : > { %p2054_p0 = scmp.ge.s32.totalorder %s2997_s18, 1  ;;  %p157_p1 = scmp.lt.s32.totalorder %s2997_s18, 3 }
   0x3   : > { %p2919_p2 = scmp.eq.s32.totalorder %s2052_s22, 0  ;;  %s2999_s23 = smov [#allocation3]  }
   0x4   : > { %p158_p3 = pnand %p2054_p0, %p157_p1  ;;  %s176_s24 = sshll.u32 %s2999_s23, 4  ;;  %s177_s24 = int_to_ptr.vmem [resolvable:$true] %s176_s24 }
   0x5   : > { %s3000_s25 = smov 64   ;;  %s3001_s26 = smov 4  }
   0x6   : > { %p2915_p4 = pneg %p158_p3  ;;  %204 = sbr.rel (%p158_p3) target bundleno = 638 (0x27e), region = 40 }
   0x8   : > { %p2916_p5 = pnand %p2919_p2, %p2915_p4 }
   0xa   : > { %2918 = dma.hbm_to_vmem [thread:$0]  (!%p2916_p5), %s175_s21, 9216, %s177_s24, [#allocation4], %s3000_s25, %s3000_s25, %s3001_s26  }
   0xb   : > { %2992 = dma.done.wait (%p2919_p2), [#allocation4], 9216  }
   0xc   : > { %2994 = vsyncadd (%p2919_p2), [#allocation4], 4294958080  ;;  %s2059_s27 = sshll.u32 %s2052_s22, 1  ;;  %v2729_v2 = vld [vmem:[%s3430_s1 + $0x38] sm:$0xff]  ;;  %v2728_v5 = vld [vmem:[%s3430_s1 + $0x30] sm:$0xff]  ;;  %s3002_s13 = smov 8   ;;  %v245_v34 = vlaneseq }
   0xd   : > { %p234_p6 = scmp.lt.s32.totalorder %s2059_s27, 3  ;;  %v2737_v4 = vld [vmem:[%s3430_s1 + $0x78] sm:$0xff]  ;;  %1004 = vmatpush.bf16.msra.mxu0 %v2729_v2  ;;  %v2736_v6 = vld [vmem:[%s3430_s1 + $0x70] sm:$0xff]  ;;  %v2727_v9 = vld [vmem:[%s3430_s1 + $0x28] sm:$0xff]  ;;  %s3003_s11 = smov 120  }
   0xe   : > { %1018 = vmatpush.bf16.msra.mxu1 %v2737_v4  ;;  %v2745_v7 = vld [vmem:[%s3430_s1 + $0xb8] sm:$0xff]  ;;  %v2744_v10 = vld [vmem:[%s3430_s1 + $0xb0] sm:$0xff]  ;;  %v2735_v11 = vld [vmem:[%s3430_s1 + $0x68] sm:$0xff]  ;;  %v3159_v35 = vshrl.u32 %v245_v34, 7 }
   0xf   : > { %s3440_s27 = smov (!%p234_p6, %s2059_s27), 3  ;;  %v2753_v8 = vld [vmem:[%s3430_s1 + $0xf8] sm:$0xff]  ;;  %1032 = vmatpush.bf16.msra.mxu2 %v2745_v7  ;;  %v2752_v12 = vld [vmem:[%s3430_s1 + $0xf0] sm:$0xff]  ;;  %v2726_v13 = vld [vmem:[%s3430_s1 + $0x20] sm:$0xff] }
  0x10   : > { %s2060_s28 = sshll.u32 %s3440_s27, 3  ;;  %1046 = vmatpush.bf16.msra.mxu3 %v2753_v8  ;;  %v2743_v14 = vld [vmem:[%s3430_s1 + $0xa8] sm:$0xff]  ;;  %v2734_v15 = vld [vmem:[%s3430_s1 + $0x60] sm:$0xff]  ;;  %v2725_v17 = vld [vmem:[%s3430_s1 + $0x18] sm:$0xff]  ;;  %v254_v36 = vand.u32 15, %v3159_v35  ;;  %vm296_vm0 = vcmp.lt.s32.totalorder %v3159_v35, 1 }
  0x11   : > { %s3053_s6 = scalar_lea.vmem %s3429_s0, %s2060_s28  ;;  %1005 = vmatpush.bf16.msra.mxu0 %v2728_v5  ;;  %v2751_v16 = vld [vmem:[%s3430_s1 + $0xe8] sm:$0xff]  ;;  %v2742_v18 = vld [vmem:[%s3430_s1 + $0xa0] sm:$0xff]  ;;  %v2733_v19 = vld [vmem:[%s3430_s1 + $0x58] sm:$0xff]  ;;  %v249_v46 = vadd.s32 8, %v3159_v35  ;;  %vm339_vm2 = vcmp.lt.s32.totalorder %v3159_v35, 7  ;;  %s243_s24 = scalar_lea.vmem %s3434_s5, %s2060_s28 }
  0x12   : > { %v3056_v0 = vld [vmem:[%s3053_s6] sm:$0xff]  ;;  %v3059_v1 = vld [vmem:[%s3053_s6 + $0x8] sm:$0xff]  ;;  %1019 = vmatpush.bf16.msra.mxu1 %v2736_v6  ;;  %v2724_v21 = vld [vmem:[%s3430_s1 + $0x10] sm:$0xff]  ;;  %vm3165_vm1 = vcmp.ge.s32.totalorder %v254_v36, 1 }
  0x13   : > { %v2934_v3 = vpack.i.bf16 %v3059_v1, %v3056_v0  ;;  %1033 = vmatpush.bf16.msra.mxu2 %v2744_v10  ;;  %v2750_v20 = vld [vmem:[%s3430_s1 + $0xe0] sm:$0xff]  ;;  %v2741_v22 = vld [vmem:[%s3430_s1 + $0x98] sm:$0xff]  ;;  %v2732_v23 = vld [vmem:[%s3430_s1 + $0x50] sm:$0xff]  ;;  %v306_v37 = vrot.slane %v3059_v1, 7  ;;  %v305_v38 = vrot.slane %v3056_v0, 7  ;;  %v349_v53 = vrot.slane %v3059_v1, 1 }
  0x14   : > { %1047 = vmatpush.bf16.msra.mxu3 %v2752_v12  ;;  %v2749_v24 = vld [vmem:[%s3430_s1 + $0xd8] sm:$0xff]  ;;  %v2723_v25 = vld [vmem:[%s3430_s1 + $0x8] sm:$0xff]  ;;  %v2722_v27 = vld [vmem:[%s3430_s1] sm:$0xff]  ;;  %v348_v54 = vrot.slane %v3056_v0, 1  ;;  %v261_v55 = vand.u32 15, %v249_v46 }
  0x15   : > { %2935 = vrot.lane.b32.xlu0 %v2934_v3, %s3002_s13  ;;  %1006 = vmatpush.bf16.msra.mxu0 %v2727_v9  ;;  %v2731_v26 = vld [vmem:[%s3430_s1 + $0x48] sm:$0xff]  ;;  %v2730_v28 = vld [vmem:[%s3430_s1 + $0x40] sm:$0xff]  ;;  %v2761_v29 = vld [vmem:[%s3430_s1 + $0x138] sm:$0xff]  ;;  %v308_v40 = vsel %vm296_vm0, %v306_v37, %v305_v38  ;;  %v307_v43 = vsel %vm296_vm0, %v305_v38, %v306_v37 }
  0x16   : > { %1020 = vmatpush.bf16.msra.mxu1 %v2735_v11  ;;  %v2769_v30 = vld [vmem:[%s3430_s1 + $0x178] sm:$0xff]  ;;  %v2760_v31 = vld [vmem:[%s3430_s1 + $0x130] sm:$0xff]  ;;  %v2759_v33 = vld [vmem:[%s3430_s1 + $0x128] sm:$0xff]  ;;  %v309_v41 = vsel %vm3165_vm1, %v308_v40, 0.0  ;;  %v312_v44 = vpack.c.bf16 %v307_v43, %v307_v43  ;;  %vm3206_vm3 = vcmp.lt.s32.totalorder %v261_v55, 15  ;;  %v351_v62 = vsel %vm339_vm2, %v349_v53, %v348_v54 }
  0x17   : > { %1034 = vmatpush.bf16.msra.mxu2 %v2743_v14  ;;  %v2768_v32 = vld [vmem:[%s3430_s1 + $0x170] sm:$0xff]  ;;  %v311_v42 = vpack.c.bf16 %v309_v41, %v309_v41  ;;  %v2767_v45 = vld [vmem:[%s3430_s1 + $0x168] sm:$0xff]  ;;  %v2758_v49 = vld [vmem:[%s3430_s1 + $0x120] sm:$0xff]  ;;  %v353_v4 = vsel %vm3206_vm3, %v351_v62, 0.0 }
  0x18   : > { %1048 = vmatpush.bf16.msra.mxu3 %v2751_v16  ;;  %314 = vst [vmem:[#allocation2 + $0x28] sm:$0xf] %v312_v44  ;;  %v2740_v47 = vld [vmem:[%s3430_s1 + $0x90] sm:$0xff]  ;;  %v2766_v50 = vld [vmem:[%s3430_s1 + $0x160] sm:$0xff]  ;;  %v2739_v56 = vld [vmem:[%s3430_s1 + $0x88] sm:$0xff]  ;;  %v355_v8 = vpack.c.bf16 %v353_v4, %v353_v4 }
  0x19   : > { %1007 = vmatpush.bf16.msra.mxu0 %v2726_v13  ;;  %313 = vst [vmem:[#allocation2 + $0x4] sm:$0xf] %v311_v42  ;;  %v2748_v48 = vld [vmem:[%s3430_s1 + $0xd0] sm:$0xff]  ;;  %v2747_v57 = vld [vmem:[%s3430_s1 + $0xc8] sm:$0xff]  ;;  %v2757_v58 = vld [vmem:[%s3430_s1 + $0x118] sm:$0xff] }
  0x1a   : > { %1021 = vmatpush.bf16.msra.mxu1 %v2734_v15  ;;  %v2765_v60 = vld [vmem:[%s3430_s1 + $0x158] sm:$0xff]  ;;  %v2738_v63 = vld [vmem:[%s3430_s1 + $0x80] sm:$0xff]  ;;  %v2764_v5 = vld [vmem:[%s3430_s1 + $0x150] sm:$0xff]  ;;  %357 = vst [vmem:[#allocation2 + $0x40] sm:$0xf] %v355_v8 }
  0x1b   : > { %1035 = vmatpush.bf16.msra.mxu2 %v2742_v18  ;;  %v2746_v2 = vld [vmem:[%s3430_s1 + $0xc0] sm:$0xff]  ;;  %v2777_v6 = vld [vmem:[%s3430_s1 + $0x1b8] sm:$0xff]  ;;  %v2755_v9 = vld [vmem:[%s3430_s1 + $0x108] sm:$0xff] }
  0x1c   : > { %1049 = vmatpush.bf16.msra.mxu3 %v2750_v20  ;;  %v2785_v7 = vld [vmem:[%s3430_s1 + $0x1f8] sm:$0xff]  ;;  %v2763_v10 = vld [vmem:[%s3430_s1 + $0x148] sm:$0xff]  ;;  %v2776_v11 = vld [vmem:[%s3430_s1 + $0x1b0] sm:$0xff] }
  0x1d   : > { %2940 = vrot.lane.b32.xlu0 %v2934_v3, %s3003_s11  ;;  %1008 = vmatpush.bf16.msra.mxu0 %v2725_v17  ;;  %v2756_v3 = vld [vmem:[%s3430_s1 + $0x110] sm:$0xff]  ;;  %v2754_v13 = vld [vmem:[%s3430_s1 + $0x100] sm:$0xff]  ;;  %v2775_v15 = vld [vmem:[%s3430_s1 + $0x1a8] sm:$0xff] }
  0x1e   : > { %1022 = vmatpush.bf16.msra.mxu1 %v2733_v19  ;;  %v2784_v12 = vld [vmem:[%s3430_s1 + $0x1f0] sm:$0xff]  ;;  %v2762_v14 = vld [vmem:[%s3430_s1 + $0x140] sm:$0xff]  ;;  %v2783_v16 = vld [vmem:[%s3430_s1 + $0x1e8] sm:$0xff]  ;;  %v3265_v19 = vand.u32 127, %v245_v34 }
  0x1f   : > { %1036 = vmatpush.bf16.msra.mxu2 %v2741_v22  ;;  %v2067_v52 = vld [vmem:[#allocation2 + $0x24] sm:$0xf0]  ;;  %v2774_v17 = vld [vmem:[%s3430_s1 + $0x1a0] sm:$0xff]  ;;  %v2773_v20 = vld [vmem:[%s3430_s1 + $0x198] sm:$0xff] }
  0x20   : > { %1050 = vmatpush.bf16.msra.mxu3 %v2749_v24  ;;  %v2713_v51 = vld [vmem:[#allocation2 + $0x4] sm:$0xf]  ;;  %v2772_v22 = vld [vmem:[%s3430_s1 + $0x190] sm:$0xff]  ;;  %vm274_vm4 = vcmp.ge.s32.totalorder %v3265_v19, 8  ;;  %v2771_v36 = vld [vmem:[%s3430_s1 + $0x188] sm:$0xff]  ;;  %vm275_vm5 = vcmp.lt.s32.totalorder %v3265_v19, 120 }
  0x21   : > { %1009 = vmatpush.bf16.msra.mxu0 %v2724_v21  ;;  %v2070_v59 = vor.u32 %v2713_v51, %v2067_v52  ;;  %v2782_v18 = vld [vmem:[%s3430_s1 + $0x1e0] sm:$0xff]  ;;  %v2781_v21 = vld [vmem:[%s3430_s1 + $0x1d8] sm:$0xff]  ;;  %v2780_v24 = vld [vmem:[%s3430_s1 + $0x1d0] sm:$0xff] }
  0x22   : > { %1023 = vmatpush.bf16.msra.mxu1 %v2732_v23  ;;  %v2779_v37 = vld [vmem:[%s3430_s1 + $0x1c8] sm:$0xff]  ;;  %v2770_v46 = vld [vmem:[%s3430_s1 + $0x180] sm:$0xff] }
  0x23   : > { %1037 = vmatpush.bf16.msra.mxu2 %v2740_v47  ;;  %v2778_v51 = vld [vmem:[%s3430_s1 + $0x1c0] sm:$0xff] }
  0x24   : > { %1051 = vmatpush.bf16.msra.mxu3 %v2748_v48 }
  0x25   : > { %1010 = vmatpush.bf16.msra.mxu0 %v2723_v25 }
  0x26   : > { %1024 = vmatpush.bf16.msra.mxu1 %v2731_v26 }
  0x27   : > { %1038 = vmatpush.bf16.msra.mxu2 %v2739_v56 }
  0x28   : > { %1052 = vmatpush.bf16.msra.mxu3 %v2747_v57 }
  0x29   : > { %1011 = vmatpush.bf16.msra.mxu0 %v2722_v27  ;;  %v350_v27 = vsel %vm339_vm2, %v348_v54, %v349_v53 }
  0x2a   : > { %1025 = vmatpush.bf16.msra.mxu1 %v2730_v28  ;;  %v354_v28 = vpack.c.bf16 %v350_v27, %v350_v27  ;;  %v2790_v27 = vld [vmem:[%s3430_s1 + $0x220] sm:$0xff] }
  0x2b   : > { %1039 = vmatpush.bf16.msra.mxu2 %v2738_v63 }
  0x2c   : > { %1053 = vmatpush.bf16.msra.mxu3 %v2746_v2  ;;  %356 = vst [vmem:[#allocation2 + $0x1c] sm:$0xf] %v354_v28 }
  0x2d   : > { %1060 = vmatpush.bf16.msrb.mxu0 %v2761_v29  ;;  %1026 = vmatmul.bf16.vlgmr.msra.gmra.mxu1 %v2070_v59 }
  0x2e   : > { %1074 = vmatpush.bf16.msrb.mxu1 %v2769_v30 }
  0x2f   : > { %1088 = vmatpush.bf16.msrb.mxu2 %v2777_v6 }
  0x30   : > { %1102 = vmatpush.bf16.msrb.mxu3 %v2785_v7 }
  0x31   : > { %1061 = vmatpush.bf16.msrb.mxu0 %v2760_v31 }
  0x32   : > { %1075 = vmatpush.bf16.msrb.mxu1 %v2768_v32 }
  0x33   : > { %1089 = vmatpush.bf16.msrb.mxu2 %v2776_v11 }
  0x34   : > { %1103 = vmatpush.bf16.msrb.mxu3 %v2784_v12 }
  0x35   : > { %1062 = vmatpush.bf16.msrb.mxu0 %v2759_v33 }
  0x36   : > { %1076 = vmatpush.bf16.msrb.mxu1 %v2767_v45 }
  0x37   : > { %1090 = vmatpush.bf16.msrb.mxu2 %v2775_v15 }
  0x38   : > { %1104 = vmatpush.bf16.msrb.mxu3 %v2783_v16  ;;  %v2792_v16 = vld [vmem:[%s3430_s1 + $0x230] sm:$0xff] }
  0x39   : > { %1063 = vmatpush.bf16.msrb.mxu0 %v2758_v49 }
  0x3a   : > { %1077 = vmatpush.bf16.msrb.mxu1 %v2766_v50 }
  0x3b   : > { %1091 = vmatpush.bf16.msrb.mxu2 %v2774_v17 }
  0x3c   : > { %1105 = vmatpush.bf16.msrb.mxu3 %v2782_v18 }
  0x3d   : > { %1064 = vmatpush.bf16.msrb.mxu0 %v2757_v58 }
  0x3e   : > { %1078 = vmatpush.bf16.msrb.mxu1 %v2765_v60 }
  0x3f   : > { %1092 = vmatpush.bf16.msrb.mxu2 %v2773_v20 }
  0x40   : > { %1106 = vmatpush.bf16.msrb.mxu3 %v2781_v21  ;;  %v2791_v21 = vld [vmem:[%s3430_s1 + $0x228] sm:$0xff] }
  0x41   : > { %1065 = vmatpush.bf16.msrb.mxu0 %v2756_v3 }
  0x42   : > { %1079 = vmatpush.bf16.msrb.mxu1 %v2764_v5 }
  0x43   : > { %1093 = vmatpush.bf16.msrb.mxu2 %v2772_v22 }
  0x44   : > { %1107 = vmatpush.bf16.msrb.mxu3 %v2780_v24 }
  0x45   : > { %1066 = vmatpush.bf16.msrb.mxu0 %v2755_v9 }
  0x46   : > { %1080 = vmatpush.bf16.msrb.mxu1 %v2763_v10 }
  0x47   : > { %1094 = vmatpush.bf16.msrb.mxu2 %v2771_v36 }
  0x48   : > { %1108 = vmatpush.bf16.msrb.mxu3 %v2779_v37 }
  0x49   : > { %1067 = vmatpush.bf16.msrb.mxu0 %v2754_v13  ;;  %v2793_v13 = vld [vmem:[%s3430_s1 + $0x238] sm:$0xff] }
  0x4a   : > { %1081 = vmatpush.bf16.msrb.mxu1 %v2762_v14 }
  0x4b   : > { %1095 = vmatpush.bf16.msrb.mxu2 %v2770_v46 }
  0x4c   : > { %1109 = vmatpush.bf16.msrb.mxu3 %v2778_v51 }
  0x87   : > { %v2936_v23 = vpop.permute.xlu0 %2935 }
  0x88   : > { %v2938_v25 = vunpack.i.h.bf16 %v2936_v23  ;;  %v2937_v26 = vunpack.i.l.bf16 %v2936_v23 }
  0x8a   : > { %v287_v29 = vsel %vm274_vm4, %v2938_v25, 0.0  ;;  %v286_v30 = vsel %vm274_vm4, %v2937_v26, 0.0 }
  0x8b   : > { %v295_v31 = vrot.slane %v287_v29, 7  ;;  %v2883_v32 = vpack.c.bf16 %v3059_v1, %v287_v29  ;;  %v338_v33 = vrot.slane %v287_v29, 1  ;;  %v294_v34 = vrot.slane %v286_v30, 7 }
  0x8c   : > { %v337_v38 = vrot.slane %v286_v30, 1 }
  0x8d   : > { %2906 = vst [vmem:[#allocation2 + $0x30] sm:$0xff] %v2883_v32   ;;  %v297_v40 = vsel %vm296_vm0, %v294_v34, %v295_v31  ;;  %v298_v41 = vsel %vm296_vm0, %v295_v31, %v294_v34  ;;  %v2788_v32 = vld [vmem:[%s3430_s1 + $0x210] sm:$0xff]  ;;  %v2091_v34 = vld [vmem:[#allocation2 + $0x3c] sm:$0xf0] }
  0x8e   : > { %v299_v42 = vsel %vm3165_vm1, %v298_v41, 0.0  ;;  %v302_v43 = vpack.c.bf16 %v297_v40, %v297_v40  ;;  %v340_v44 = vsel %vm339_vm2, %v337_v38, %v338_v33  ;;  %v341_v45 = vsel %vm339_vm2, %v338_v33, %v337_v38  ;;  %v2716_v33 = vld [vmem:[#allocation2 + $0x1c] sm:$0xf]  ;;  %v2787_v40 = vld [vmem:[%s3430_s1 + $0x208] sm:$0xff] }
  0x8f   : > { %v301_v47 = vpack.c.bf16 %v299_v42, %v299_v42  ;;  %v343_v48 = vsel %vm3206_vm3, %v341_v45, 0.0  ;;  %v344_v49 = vpack.c.bf16 %v340_v44, %v340_v44  ;;  %v2941_v50 = vpop.permute.xlu0 %2940  ;;  %v2094_v38 = vor.u32 %v2716_v33, %v2091_v34  ;;  %v2786_v42 = vld [vmem:[%s3430_s1 + $0x200] sm:$0xff]  ;;  %v2849_v33 = vld [vmem:[#allocation3 + $0x170] sm:$0xff] }
  0x90   : > { %304 = vst [vmem:[#allocation2 + $0x24] sm:$0xf] %v302_v43  ;;  %v345_v52 = vpack.c.bf16 %v343_v48, %v343_v48  ;;  %v2943_v53 = vunpack.i.h.bf16 %v2941_v50  ;;  %v2942_v54 = vunpack.i.l.bf16 %v2941_v50  ;;  %v2817_v48 = vld [vmem:[#allocation3 + $0x70] sm:$0xff]  ;;  %v2954_v50 = vld [vmem:[%s3431_s2] ss:$0 sm:$0xff] }
  0x91   : > { %303 = vst [vmem:[#allocation2] sm:$0xf] %v301_v47  ;;  %v2818_v47 = vld [vmem:[#allocation3 + $0x78] sm:$0xff] }
  0x92   : > { %346 = vst [vmem:[#allocation2 + $0x18] sm:$0xf] %v344_v49  ;;  %v293_v55 = vsel %vm275_vm5, %v2943_v53, 0.0  ;;  %v292_v56 = vsel %vm275_vm5, %v2942_v54, 0.0  ;;  %v2815_v54 = vld [vmem:[#allocation3 + $0x60] sm:$0xff] }
  0x93   : > { %347 = vst [vmem:[#allocation2 + $0x3c] sm:$0xf] %v345_v52  ;;  %v316_v57 = vrot.slane %v293_v55, 7  ;;  %v334_v58 = vpack.c.bf16 %v293_v55, %v293_v55  ;;  %v359_v59 = vrot.slane %v293_v55, 1  ;;  %v315_v60 = vrot.slane %v292_v56, 7  ;;  %v2816_v52 = vld [vmem:[#allocation3 + $0x68] sm:$0xff] }
  0x94   : > { %v2888_v62 = vpack.c.bf16 %v292_v56, %v3056_v0  ;;  %v358_v63 = vrot.slane %v292_v56, 1  ;;  %v2075_v24 = vld [vmem:[#allocation2 + $0x2c] sm:$0xf0]  ;;  %v2719_v29 = vld [vmem:[#allocation2 + $0x30] sm:$0xf0] }
  0x95   : > { %336 = vst [vmem:[#allocation2 + $0x38] sm:$0xf] %v334_v58  ;;  %v317_v2 = vsel %vm296_vm0, %v315_v60, %v316_v57  ;;  %v318_v3 = vsel %vm296_vm0, %v316_v57, %v315_v60  ;;  %v2814_v60 = vld [vmem:[#allocation3 + $0x58] sm:$0xff] }
  0x96   : > { %v319_v4 = vsel %vm3165_vm1, %v318_v3, 0.0  ;;  %v322_v5 = vpack.c.bf16 %v317_v2, %v317_v2  ;;  %2907 = vst [vmem:[#allocation2 + $0x10] sm:$0xff] %v2888_v62   ;;  %v360_v6 = vsel %vm339_vm2, %v358_v63, %v359_v59  ;;  %v361_v7 = vsel %vm339_vm2, %v359_v59, %v358_v63  ;;  %v2813_v2 = vld [vmem:[#allocation3 + $0x50] sm:$0xff] }
  0x97   : > { %v2878_v0 = vpack.c.bf16 %v286_v30, %v319_v4  ;;  %v363_v8 = vsel %vm3206_vm3, %v361_v7, 0.0  ;;  %v364_v9 = vpack.c.bf16 %v360_v6, %v360_v6  ;;  %v2717_v10 = vld [vmem:[#allocation2 + $0x20] sm:$0xf0]  ;;  %v2789_v30 = vld [vmem:[%s3430_s1 + $0x218] sm:$0xff]  ;;  %v2812_v7 = vld [vmem:[#allocation3 + $0x48] sm:$0xff] }
  0x98   : > { %324 = vst [vmem:[#allocation2 + $0x2c] sm:$0xf] %v322_v5  ;;  %v365_v11 = vpack.c.bf16 %v363_v8, %v363_v8  ;;  %v2065_v12 = vld [vmem:[#allocation2] sm:$0xf] }
  0x99   : > { %2905 = vst [vmem:[#allocation2 + $0x8] sm:$0xff] %v2878_v0   ;;  %v2066_v14 = vor.u32 %v2717_v10, %v2065_v12  ;;  %v2089_v36 = vld [vmem:[#allocation2 + $0x18] sm:$0xf] }
  0x9a   : > { %366 = vst [vmem:[#allocation2 + $0x20] sm:$0xf] %v364_v9  ;;  %v2720_v37 = vld [vmem:[#allocation2 + $0x38] sm:$0xf0] }
  0x9b   : > { %367 = vst [vmem:[#allocation2 + $0x44] sm:$0xf] %v365_v11  ;;  %1012 = vmatmul.bf16.vlgmr.msra.gmra.mxu0 %v2066_v14  ;;  %v2090_v41 = vor.u32 %v2720_v37, %v2089_v36  ;;  %v2811_v11 = vld [vmem:[#allocation3 + $0x40] sm:$0xff]  ;;  %v2824_v36 = vld [vmem:[#allocation3 + $0xa8] sm:$0xff] }
  0x9c   : > { %1116 = vmatpush.bf16.msra.mxu0 %v2793_v13  ;;  %v2083_v15 = vld [vmem:[#allocation2 + $0x34] sm:$0xf0]  ;;  %v2832_v37 = vld [vmem:[#allocation3 + $0xe8] sm:$0xff] }
  0x9d   : > { %v2715_v17 = vld [vmem:[#allocation2 + $0x14] sm:$0xf]  ;;  %v2081_v28 = vld [vmem:[#allocation2 + $0x10] sm:$0xf] }
  0x9e   : > { %v2086_v18 = vor.u32 %v2715_v17, %v2083_v15  ;;  %v2082_v31 = vor.u32 %v2719_v29, %v2081_v28  ;;  %v2810_v17 = vld [vmem:[#allocation3 + $0x38] sm:$0xff] }
  0x9f   : > { %v2718_v20 = vld [vmem:[#allocation2 + $0x28] sm:$0xf0]  ;;  %1852 = vmatpush.bf16.msra.mxu1 %v2810_v17  ;;  %v2850_v28 = vld [vmem:[#allocation3 + $0x178] sm:$0xff] }
  0xa0   : > { %1082 = vmatmul.bf16.vlgmr.msrb.gmra.mxu1 %v2086_v18  ;;  %1117 = vmatpush.bf16.msra.mxu0 %v2792_v16  ;;  %v2073_v22 = vld [vmem:[#allocation2 + $0x8] sm:$0xf]  ;;  %v2714_v23 = vld [vmem:[#allocation2 + $0xc] sm:$0xf] }
  0xa1   : > { %v2074_v25 = vor.u32 %v2718_v20, %v2073_v22  ;;  %v2078_v26 = vor.u32 %v2714_v23, %v2075_v24  ;;  %v2097_v43 = vld [vmem:[#allocation2 + $0x20] sm:$0xf]  ;;  %v2847_v17 = vld [vmem:[#allocation3 + $0x160] sm:$0xff] }
  0xa2   : > { %v2721_v44 = vld [vmem:[#allocation2 + $0x40] sm:$0xf0] }
  0xa3   : > { %1040 = vmatmul.bf16.vlgmr.msra.gmra.mxu2 %v2074_v25  ;;  %1054 = vmatmul.bf16.vlgmr.msra.gmra.mxu3 %v2078_v26  ;;  %v2098_v45 = vor.u32 %v2721_v44, %v2097_v43  ;;  %v2826_v22 = vld [vmem:[#allocation3 + $0xb8] sm:$0xff]  ;;  %v2825_v25 = vld [vmem:[#allocation3 + $0xb0] sm:$0xff] }
  0xa4   : > { %1118 = vmatpush.bf16.msra.mxu0 %v2791_v21  ;;  %1866 = vmatpush.bf16.msra.mxu2 %v2818_v47  ;;  %v2809_v21 = vld [vmem:[#allocation3 + $0x30] sm:$0xff]  ;;  %v2834_v23 = vld [vmem:[#allocation3 + $0xf8] sm:$0xff] }
  0xa5   : > { %1880 = vmatpush.bf16.msra.mxu3 %v2826_v22  ;;  %v2833_v26 = vld [vmem:[#allocation3 + $0xf0] sm:$0xff]  ;;  %1853 = vmatpush.bf16.msra.mxu1 %v2809_v21  ;;  %v2838_v21 = vld [vmem:[#allocation3 + $0x118] sm:$0xff] }
  0xa6   : > { %v2846_v22 = vld [vmem:[#allocation3 + $0x158] sm:$0xff] }
  0xa8   : > { %1119 = vmatpush.bf16.msra.mxu0 %v2790_v27  ;;  %1867 = vmatpush.bf16.msra.mxu2 %v2817_v48 }
  0xa9   : > { %1881 = vmatpush.bf16.msra.mxu3 %v2825_v25  ;;  %v2837_v25 = vld [vmem:[#allocation3 + $0x110] sm:$0xff] }
  0xaa   : > { %v1027_v49 = vpop.f32.mrf.mxu1 }
  0xab   : > { %1068 = vmatmul.bf16.vlgmr.msrb.gmra.mxu0 %v2082_v31 }
  0xac   : > { %1120 = vmatpush.bf16.msra.mxu0 %v2789_v30  ;;  %1868 = vmatpush.bf16.msra.mxu2 %v2816_v52  ;;  %v2808_v30 = vld [vmem:[#allocation3 + $0x28] sm:$0xff] }
  0xad   : > { %1854 = vmatpush.bf16.msra.mxu1 %v2808_v30  ;;  %1882 = vmatpush.bf16.msra.mxu3 %v2824_v36  ;;  %v2844_v30 = vld [vmem:[#allocation3 + $0x148] sm:$0xff] }
  0xae   : > { %v2856_v36 = vld [vmem:[#allocation3 + $0x1a8] sm:$0xff] }
  0xb0   : > { %1121 = vmatpush.bf16.msra.mxu0 %v2788_v32  ;;  %1869 = vmatpush.bf16.msra.mxu2 %v2815_v54  ;;  %v2822_v54 = vld [vmem:[#allocation3 + $0x98] sm:$0xff] }
  0xb2   : > { %v1029_v58 = vpop.f32.mrf.mxu1 }
  0xb3   : > { %1096 = vmatmul.bf16.vlgmr.msrb.gmra.mxu2 %v2090_v41  ;;  %1110 = vmatmul.bf16.vlgmr.msrb.gmra.mxu3 %v2094_v38  ;;  %v2807_v41 = vld [vmem:[#allocation3 + $0x20] sm:$0xff] }
  0xb4   : > { %1122 = vmatpush.bf16.msra.mxu0 %v2787_v40  ;;  %1870 = vmatpush.bf16.msra.mxu2 %v2814_v60 }
  0xb5   : > { %1855 = vmatpush.bf16.msra.mxu1 %v2807_v41  ;;  %v2854_v41 = vld [vmem:[#allocation3 + $0x198] sm:$0xff] }
  0xb8   : > { %1123 = vmatpush.bf16.msra.mxu0 %v2786_v42  ;;  %1871 = vmatpush.bf16.msra.mxu2 %v2813_v2 }
  0xbb   : > { %1124 = vmatmul.bf16.vlgmr.msra.gmra.mxu0 %v2098_v45  ;;  %v2823_v45 = vld [vmem:[#allocation3 + $0xa0] sm:$0xff] }
  0xbc   : > { %1872 = vmatpush.bf16.msra.mxu2 %v2812_v7  ;;  %1894 = vmatpush.bf16.msrb.mxu0 %v2834_v23  ;;  %v2803_v7 = vld [vmem:[#allocation3] sm:$0xff] }
  0xbd   : > { %1883 = vmatpush.bf16.msra.mxu3 %v2823_v45  ;;  %v2819_v23 = vld [vmem:[#allocation3 + $0x80] sm:$0xff]  ;;  %v2853_v45 = vld [vmem:[#allocation3 + $0x190] sm:$0xff] }
  0xc0   : > { %1873 = vmatpush.bf16.msra.mxu2 %v2811_v11  ;;  %1895 = vmatpush.bf16.msrb.mxu0 %v2833_v26  ;;  %v2841_v11 = vld [vmem:[#allocation3 + $0x130] sm:$0xff] }
  0xc1   : > { %1884 = vmatpush.bf16.msra.mxu3 %v2822_v54  ;;  %v2845_v26 = vld [vmem:[#allocation3 + $0x150] sm:$0xff] }
  0xc4   : > { %1922 = vmatpush.bf16.msrb.mxu2 %v2850_v28  ;;  %1896 = vmatpush.bf16.msrb.mxu0 %v2832_v37  ;;  %v2866_v28 = vld [vmem:[#allocation3 + $0x1f8] sm:$0xff]  ;;  %v2864_v37 = vld [vmem:[#allocation3 + $0x1e8] sm:$0xff] }
  0xc8   : > { %1923 = vmatpush.bf16.msrb.mxu2 %v2849_v33  ;;  %v2835_v33 = vld [vmem:[#allocation3 + $0x100] sm:$0xff] }
 0x118   : > { %v1013_v46 = vpop.f32.mrf.mxu0 }
 0x119   : > { %v1014_v53 = vadd.f32 %v2954_v50, %v1013_v46  ;;  %v2831_v46 = vld [vmem:[#allocation3 + $0xe0] sm:$0xff] }
 0x11a   : > { %1897 = vmatpush.bf16.msrb.mxu0 %v2831_v46  ;;  %v2861_v46 = vld [vmem:[#allocation3 + $0x1d0] sm:$0xff] }
 0x11b   : > { %v1028_v57 = vadd.f32 %v1027_v49, %v1014_v53  ;;  %v2806_v49 = vld [vmem:[#allocation3 + $0x18] sm:$0xff] }
 0x11c   : > { %1856 = vmatpush.bf16.msra.mxu1 %v2806_v49 }
 0x11d   : > { %v1083_v10 = vpop.f32.mrf.mxu1 }
 0x120   : > { %v1015_v51 = vpop.f32.mrf.mxu0 }
 0x121   : > { %v1016_v63 = vadd.f32 %v2954_v50, %v1015_v51 }
 0x123   : > { %v1030_v6 = vadd.f32 %v1029_v58, %v1016_v63 }
 0x125   : > { %v1085_v27 = vpop.f32.mrf.mxu1 }
 0x126   : > { %v1041_v55 = vpop.f32.mrf.mxu2  ;;  %v1055_v56 = vpop.f32.mrf.mxu3 }
 0x127   : > { %v1042_v62 = vadd.f32 %v1041_v55, %v1028_v57  ;;  %v2830_v55 = vld [vmem:[#allocation3 + $0xd8] sm:$0xff] }
 0x128   : > { %v1069_v59 = vpop.f32.mrf.mxu0  ;;  %1898 = vmatpush.bf16.msrb.mxu0 %v2830_v55 }
 0x129   : > { %v1056_v3 = vadd.f32 %v1055_v56, %v1042_v62 }
 0x12b   : > { %v1070_v8 = vadd.f32 %v1069_v59, %v1056_v3  ;;  %v2805_v3 = vld [vmem:[#allocation3 + $0x10] sm:$0xff] }
 0x12c   : > { %1857 = vmatpush.bf16.msra.mxu1 %v2805_v3 }
 0x12d   : > { %v1084_v13 = vadd.f32 %v1083_v10, %v1070_v8  ;;  %v2842_v8 = vld [vmem:[#allocation3 + $0x138] sm:$0xff] }
 0x12e   : > { %v1043_v4 = vpop.f32.mrf.mxu2  ;;  %v1057_v5 = vpop.f32.mrf.mxu3 }
 0x12f   : > { %v1044_v9 = vadd.f32 %v1043_v4, %v1030_v6  ;;  %v2804_v6 = vld [vmem:[#allocation3 + $0x8] sm:$0xff] }
 0x130   : > { %v1071_v0 = vpop.f32.mrf.mxu0  ;;  %1858 = vmatpush.bf16.msra.mxu1 %v2804_v6 }
 0x131   : > { %v1058_v12 = vadd.f32 %v1057_v5, %v1044_v9 }
 0x133   : > { %v1072_v20 = vadd.f32 %v1071_v0, %v1058_v12  ;;  %v2840_v12 = vld [vmem:[#allocation3 + $0x128] sm:$0xff] }
 0x134   : > { %1859 = vmatpush.bf16.msra.mxu1 %v2803_v7  ;;  %v2851_v7 = vld [vmem:[#allocation3 + $0x180] sm:$0xff] }
 0x135   : > { %v1086_v29 = vadd.f32 %v1085_v27, %v1072_v20  ;;  %v2828_v20 = vld [vmem:[#allocation3 + $0xc8] sm:$0xff]  ;;  %v2858_v27 = vld [vmem:[#allocation3 + $0x1b8] sm:$0xff] }
 0x136   : > { %v1097_v14 = vpop.f32.mrf.mxu2  ;;  %v1111_v15 = vpop.f32.mrf.mxu3 }
 0x137   : > { %v1098_v16 = vadd.f32 %v1097_v14, %v1084_v13  ;;  %v2848_v13 = vld [vmem:[#allocation3 + $0x168] sm:$0xff]  ;;  %v2821_v14 = vld [vmem:[#allocation3 + $0x90] sm:$0xff] }
 0x138   : > { %v1125_v18 = vpop.f32.mrf.mxu0  ;;  %1908 = vmatpush.bf16.msrb.mxu1 %v2842_v8  ;;  %1924 = vmatpush.bf16.msrb.mxu2 %v2848_v13 }
 0x139   : > { %v1112_v24 = vadd.f32 %v1111_v15, %v1098_v16  ;;  %v2829_v15 = vld [vmem:[#allocation3 + $0xd0] sm:$0xff]  ;;  %v2839_v16 = vld [vmem:[#allocation3 + $0x120] sm:$0xff]  ;;  %1885 = vmatpush.bf16.msra.mxu3 %v2821_v14 }
 0x13a   : > { %1899 = vmatpush.bf16.msrb.mxu0 %v2829_v15 }
 0x13b   : > { %v1126_v31 = vadd.f32 %v1125_v18, %v1112_v24  ;;  %v2820_v18 = vld [vmem:[#allocation3 + $0x88] sm:$0xff]  ;;  %v2827_v24 = vld [vmem:[#allocation3 + $0xc0] sm:$0xff] }
 0x13c   : > { %1909 = vmatpush.bf16.msrb.mxu1 %v2841_v11  ;;  %1925 = vmatpush.bf16.msrb.mxu2 %v2847_v17 }
 0x13d   : > { %v3358_v42 = vmax.f32 %v1126_v31, 0.0  ;;  %1886 = vmatpush.bf16.msra.mxu3 %v2820_v18  ;;  %v2857_v31 = vld [vmem:[#allocation3 + $0x1b0] sm:$0xff] }
 0x13e   : > { %v1099_v32 = vpop.f32.mrf.mxu2  ;;  %v1113_v38 = vpop.f32.mrf.mxu3  ;;  %1900 = vmatpush.bf16.msrb.mxu0 %v2828_v20 }
 0x13f   : > { %v1100_v34 = vadd.f32 %v1099_v32, %v1086_v29  ;;  %v1154_v48 = vrot.slane %v3358_v42, 7  ;;  %v1196_v50 = vrot.slane %v3358_v42, 1  ;;  %v2836_v29 = vld [vmem:[#allocation3 + $0x108] sm:$0xff]  ;;  %v2865_v32 = vld [vmem:[#allocation3 + $0x1f0] sm:$0xff] }
 0x140   : > { %v1127_v43 = vpop.f32.mrf.mxu0  ;;  %1910 = vmatpush.bf16.msrb.mxu1 %v2840_v12  ;;  %1926 = vmatpush.bf16.msrb.mxu2 %v2846_v22 }
 0x141   : > { %v1114_v40 = vadd.f32 %v1113_v38, %v1100_v34  ;;  %1887 = vmatpush.bf16.msra.mxu3 %v2819_v23  ;;  %v2843_v34 = vld [vmem:[#allocation3 + $0x140] sm:$0xff] }
 0x142   : > { %1901 = vmatpush.bf16.msrb.mxu0 %v2827_v24  ;;  %v2855_v38 = vld [vmem:[#allocation3 + $0x1a0] sm:$0xff] }
 0x143   : > { %v1128_v44 = vadd.f32 %v1127_v43, %v1114_v40  ;;  %v2863_v40 = vld [vmem:[#allocation3 + $0x1e0] sm:$0xff]  ;;  %v2862_v43 = vld [vmem:[#allocation3 + $0x1d8] sm:$0xff] }
 0x144   : > { %1911 = vmatpush.bf16.msrb.mxu1 %v2839_v16  ;;  %1927 = vmatpush.bf16.msrb.mxu2 %v2845_v26 }
 0x145   : > { %v3360_v47 = vmax.f32 %v1128_v44, 0.0  ;;  %1936 = vmatpush.bf16.msrb.mxu3 %v2858_v27 }
 0x146   : > { %1950 = vmatpush.bf16.msra.mxu0 %v2866_v28 }
 0x147   : > { %v1155_v51 = vrot.slane %v3360_v47, 7  ;;  %v1197_v52 = vrot.slane %v3360_v47, 1  ;;  %v2944_v53 = vpack.i.bf16 %v3360_v47, %v3358_v42 }
 0x148   : > { %1912 = vmatpush.bf16.msrb.mxu1 %v2838_v21  ;;  %1928 = vmatpush.bf16.msrb.mxu2 %v2844_v30  ;;  %v2874_v30 = vld [vmem:[#allocation3 + $0x238] sm:$0xff] }
 0x149   : > { %v1156_v56 = vsel %vm296_vm0, %v1154_v48, %v1155_v51  ;;  %v1157_v57 = vsel %vm296_vm0, %v1155_v51, %v1154_v48  ;;  %v1198_v58 = vsel %vm339_vm2, %v1196_v50, %v1197_v52  ;;  %v1199_v59 = vsel %vm339_vm2, %v1197_v52, %v1196_v50  ;;  %2945 = vrot.lane.b32.xlu1 %v2944_v53, %s3002_s13 }
 0x14a   : > { %v1158_v60 = vsel %vm3165_vm1, %v1157_v57, 0.0  ;;  %v1161_v62 = vpack.c.bf16 %v1156_v56, %v1156_v56  ;;  %v1201_v63 = vsel %vm3206_vm3, %v1199_v59, 0.0  ;;  %v1202_v2 = vpack.c.bf16 %v1198_v58, %v1198_v58  ;;  %1937 = vmatpush.bf16.msrb.mxu3 %v2857_v31  ;;  %1951 = vmatpush.bf16.msra.mxu0 %v2865_v32  ;;  %v2852_v56 = vld [vmem:[#allocation3 + $0x188] sm:$0xff]  ;;  %v2873_v32 = vld [vmem:[#allocation3 + $0x230] sm:$0xff] }
 0x14b   : > { %v1160_v4 = vpack.c.bf16 %v1158_v60, %v1158_v60  ;;  %v1203_v5 = vpack.c.bf16 %v1201_v63, %v1201_v63  ;;  %v2860_v57 = vld [vmem:[#allocation3 + $0x1c8] sm:$0xff] }
 0x14c   : > { %1163 = vst [vmem:[#allocation2 + $0x28] sm:$0xf] %v1161_v62  ;;  %1913 = vmatpush.bf16.msrb.mxu1 %v2837_v25  ;;  %1929 = vmatpush.bf16.msrb.mxu2 %v2843_v34 }
 0x14d   : > { %1162 = vst [vmem:[#allocation2 + $0x4] sm:$0xf] %v1160_v4 }
 0x14e   : > { %1204 = vst [vmem:[#allocation2 + $0x1c] sm:$0xf] %v1202_v2  ;;  %1938 = vmatpush.bf16.msrb.mxu3 %v2856_v36  ;;  %1952 = vmatpush.bf16.msra.mxu0 %v2864_v37  ;;  %v2872_v36 = vld [vmem:[#allocation3 + $0x228] sm:$0xff] }
 0x14f   : > { %1205 = vst [vmem:[#allocation2 + $0x40] sm:$0xf] %v1203_v5 }
 0x150   : > { %1914 = vmatpush.bf16.msrb.mxu1 %v2836_v29 }
 0x151   : > { %2950 = vrot.lane.b32.xlu1 %v2944_v53, %s3003_s11 }
 0x152   : > { %1939 = vmatpush.bf16.msrb.mxu3 %v2855_v38  ;;  %1953 = vmatpush.bf16.msra.mxu0 %v2863_v40 }
 0x153   : > { %v2391_v0 = vld [vmem:[#allocation2 + $0x24] sm:$0xf0] }
 0x154   : > { %v2794_v9 = vld [vmem:[#allocation2 + $0x4] sm:$0xf]  ;;  %1915 = vmatpush.bf16.msrb.mxu1 %v2835_v33 }
 0x155   : > { %v2394_v10 = vor.u32 %v2794_v9, %v2391_v0  ;;  %v2859_v0 = vld [vmem:[#allocation3 + $0x1c0] sm:$0xff] }
 0x156   : > { %1940 = vmatpush.bf16.msrb.mxu3 %v2854_v41  ;;  %1954 = vmatpush.bf16.msra.mxu0 %v2862_v43  ;;  %v2871_v43 = vld [vmem:[#allocation3 + $0x220] sm:$0xff] }
 0x157   : > { %1874 = vmatmul.bf16.vlgmr.msra.gmra.mxu2 %v2394_v10 }
 0x15a   : > { %1941 = vmatpush.bf16.msrb.mxu3 %v2853_v45  ;;  %1955 = vmatpush.bf16.msra.mxu0 %v2861_v46  ;;  %v2870_v46 = vld [vmem:[#allocation3 + $0x218] sm:$0xff] }
 0x15e   : > { %1942 = vmatpush.bf16.msrb.mxu3 %v2852_v56  ;;  %1956 = vmatpush.bf16.msra.mxu0 %v2860_v57  ;;  %v2867_v57 = vld [vmem:[#allocation3 + $0x200] sm:$0xff] }
 0x162   : > { %1943 = vmatpush.bf16.msrb.mxu3 %v2851_v7  ;;  %1957 = vmatpush.bf16.msra.mxu0 %v2859_v0 }
 0x1bb   : > { %v2946_v44 = vpop.permute.xlu1 %2945 }
 0x1bc   : > { %v2948_v48 = vunpack.i.h.bf16 %v2946_v44  ;;  %v2947_v49 = vunpack.i.l.bf16 %v2946_v44 }
 0x1be   : > { %v1137_v50 = vsel %vm274_vm4, %v2948_v48, 0.0  ;;  %v1136_v51 = vsel %vm274_vm4, %v2947_v49, 0.0  ;;  %v2869_v49 = vld [vmem:[#allocation3 + $0x210] sm:$0xff] }
 0x1bf   : > { %v1145_v52 = vrot.slane %v1137_v50, 7  ;;  %v2898_v53 = vpack.c.bf16 %v3360_v47, %v1137_v50  ;;  %v1187_v54 = vrot.slane %v1137_v50, 1  ;;  %v1144_v55 = vrot.slane %v1136_v51, 7  ;;  %v2797_v50 = vld [vmem:[#allocation2 + $0x1c] sm:$0xf] }
 0x1c0   : > { %v1186_v58 = vrot.slane %v1136_v51, 1 }
 0x1c1   : > { %2909 = vst [vmem:[#allocation2 + $0x30] sm:$0xff] %v2898_v53   ;;  %v1146_v59 = vsel %vm296_vm0, %v1144_v55, %v1145_v52  ;;  %v1147_v60 = vsel %vm296_vm0, %v1145_v52, %v1144_v55  ;;  %v2415_v53 = vld [vmem:[#allocation2 + $0x3c] sm:$0xf0] }
 0x1c2   : > { %v1148_v62 = vsel %vm3165_vm1, %v1147_v60, 0.0  ;;  %v1151_v63 = vpack.c.bf16 %v1146_v59, %v1146_v59  ;;  %v1188_v47 = vsel %vm339_vm2, %v1186_v58, %v1187_v54  ;;  %v1189_v2 = vsel %vm339_vm2, %v1187_v54, %v1186_v58  ;;  %v2868_v54 = vld [vmem:[#allocation3 + $0x208] sm:$0xff] }
 0x1c3   : > { %v1150_v3 = vpack.c.bf16 %v1148_v62, %v1148_v62  ;;  %v1191_v4 = vsel %vm3206_vm3, %v1189_v2, 0.0  ;;  %v1192_v5 = vpack.c.bf16 %v1188_v47, %v1188_v47  ;;  %v2951_v6 = vpop.permute.xlu1 %2950  ;;  %v2418_v56 = vor.u32 %v2797_v50, %v2415_v53 }
 0x1c4   : > { %1153 = vst [vmem:[#allocation2 + $0x24] sm:$0xf] %v1151_v63  ;;  %v1193_v8 = vpack.c.bf16 %v1191_v4, %v1191_v4  ;;  %v2953_v9 = vunpack.i.h.bf16 %v2951_v6  ;;  %v2952_v10 = vunpack.i.l.bf16 %v2951_v6  ;;  %v2955_v63 = vld [vmem:[%s3433_s4] ss:$0 sm:$0xff] }
 0x1c5   : > { %1152 = vst [vmem:[#allocation2] sm:$0xf] %v1150_v3 }
 0x1c6   : > { %1194 = vst [vmem:[#allocation2 + $0x18] sm:$0xf] %v1192_v5  ;;  %v1143_v11 = vsel %vm275_vm5, %v2953_v9, 0.0  ;;  %v1142_v12 = vsel %vm275_vm5, %v2952_v10, 0.0 }
 0x1c7   : > { %1195 = vst [vmem:[#allocation2 + $0x3c] sm:$0xf] %v1193_v8  ;;  %v1165_v13 = vrot.slane %v1143_v11, 7  ;;  %v1183_v14 = vpack.c.bf16 %v1143_v11, %v1143_v11  ;;  %v1207_v15 = vrot.slane %v1143_v11, 1  ;;  %v1164_v16 = vrot.slane %v1142_v12, 7 }
 0x1c8   : > { %v2903_v17 = vpack.c.bf16 %v1142_v12, %v3358_v42  ;;  %v1206_v18 = vrot.slane %v1142_v12, 1  ;;  %v2399_v38 = vld [vmem:[#allocation2 + $0x2c] sm:$0xf0]  ;;  %v2800_v45 = vld [vmem:[#allocation2 + $0x30] sm:$0xf0] }
 0x1c9   : > { %1185 = vst [vmem:[#allocation2 + $0x38] sm:$0xf] %v1183_v14  ;;  %v1166_v20 = vsel %vm296_vm0, %v1164_v16, %v1165_v13  ;;  %v1167_v21 = vsel %vm296_vm0, %v1165_v13, %v1164_v16 }
 0x1ca   : > { %v1168_v19 = vsel %vm3165_vm1, %v1167_v21, 0.0  ;;  %v1171_v22 = vpack.c.bf16 %v1166_v20, %v1166_v20  ;;  %2910 = vst [vmem:[#allocation2 + $0x10] sm:$0xff] %v2903_v17   ;;  %v1208_v23 = vsel %vm339_vm2, %v1206_v18, %v1207_v15  ;;  %v1209_v24 = vsel %vm339_vm2, %v1207_v15, %v1206_v18 }
 0x1cb   : > { %v2893_v42 = vpack.c.bf16 %v1136_v51, %v1168_v19  ;;  %v1211_v25 = vsel %vm3206_vm3, %v1209_v24, 0.0  ;;  %v1212_v26 = vpack.c.bf16 %v1208_v23, %v1208_v23  ;;  %v2798_v27 = vld [vmem:[#allocation2 + $0x20] sm:$0xf0] }
 0x1cc   : > { %1173 = vst [vmem:[#allocation2 + $0x2c] sm:$0xf] %v1171_v22  ;;  %v1213_v28 = vpack.c.bf16 %v1211_v25, %v1211_v25  ;;  %v2389_v29 = vld [vmem:[#allocation2] sm:$0xf] }
 0x1cd   : > { %2908 = vst [vmem:[#allocation2 + $0x8] sm:$0xff] %v2893_v42   ;;  %v2390_v39 = vor.u32 %v2798_v27, %v2389_v29  ;;  %v2413_v51 = vld [vmem:[#allocation2 + $0x18] sm:$0xf]  ;;  %v2956_v27 = vld [vmem:[%s3053_s6] sm:$0xff] }
 0x1ce   : > { %1214 = vst [vmem:[#allocation2 + $0x20] sm:$0xf] %v1212_v26  ;;  %v2801_v52 = vld [vmem:[#allocation2 + $0x38] sm:$0xf0] }
 0x1cf   : > { %1215 = vst [vmem:[#allocation2 + $0x44] sm:$0xf] %v1213_v28  ;;  %1860 = vmatmul.bf16.vlgmr.msra.gmra.mxu1 %v2390_v39  ;;  %v2414_v55 = vor.u32 %v2801_v52, %v2413_v51 }
 0x1d0   : > { %1964 = vmatpush.bf16.msra.mxu1 %v2874_v30  ;;  %v2407_v31 = vld [vmem:[#allocation2 + $0x34] sm:$0xf0] }
 0x1d1   : > { %v2796_v35 = vld [vmem:[#allocation2 + $0x14] sm:$0xf]  ;;  %v2405_v44 = vld [vmem:[#allocation2 + $0x10] sm:$0xf] }
 0x1d2   : > { %v2410_v33 = vor.u32 %v2796_v35, %v2407_v31  ;;  %v2406_v48 = vor.u32 %v2800_v45, %v2405_v44 }
 0x1d3   : > { %v2799_v34 = vld [vmem:[#allocation2 + $0x28] sm:$0xf0] }
 0x1d4   : > { %1930 = vmatmul.bf16.vlgmr.msrb.gmra.mxu2 %v2410_v33  ;;  %1965 = vmatpush.bf16.msra.mxu1 %v2873_v32  ;;  %v2397_v61 = vld [vmem:[#allocation2 + $0x8] sm:$0xf]  ;;  %v2795_v37 = vld [vmem:[#allocation2 + $0xc] sm:$0xf] }
 0x1d5   : > { %v2398_v40 = vor.u32 %v2799_v34, %v2397_v61  ;;  %v2402_v41 = vor.u32 %v2795_v37, %v2399_v38  ;;  %v2421_v58 = vld [vmem:[#allocation2 + $0x20] sm:$0xf] }
 0x1d6   : > { %v2802_v59 = vld [vmem:[#allocation2 + $0x40] sm:$0xf0] }
 0x1d7   : > { %1888 = vmatmul.bf16.vlgmr.msra.gmra.mxu3 %v2398_v40  ;;  %1902 = vmatmul.bf16.vlgmr.msrb.gmra.mxu0 %v2402_v41  ;;  %v2422_v60 = vor.u32 %v2802_v59, %v2421_v58 }
 0x1d8   : > { %1966 = vmatpush.bf16.msra.mxu1 %v2872_v36 }
 0x1da   : > { %v1875_v47 = vpop.f32.mrf.mxu2 }
 0x1dc   : > { %1967 = vmatpush.bf16.msra.mxu1 %v2871_v43 }
 0x1df   : > { %1916 = vmatmul.bf16.vlgmr.msrb.gmra.mxu1 %v2406_v48 }
 0x1e0   : > { %1968 = vmatpush.bf16.msra.mxu1 %v2870_v46 }
 0x1e2   : > { %v1877_v8 = vpop.f32.mrf.mxu2 }
 0x1e4   : > { %1969 = vmatpush.bf16.msra.mxu1 %v2869_v49 }
 0x1e7   : > { %1944 = vmatmul.bf16.vlgmr.msrb.gmra.mxu3 %v2414_v55  ;;  %1958 = vmatmul.bf16.vlgmr.msra.gmra.mxu0 %v2418_v56 }
 0x1e8   : > { %1970 = vmatpush.bf16.msra.mxu1 %v2868_v54 }
 0x1ec   : > { %1971 = vmatpush.bf16.msra.mxu1 %v2867_v57 }
 0x1ef   : > { %1972 = vmatmul.bf16.vlgmr.msra.gmra.mxu1 %v2422_v60 }
 0x24c   : > { %v1861_v62 = vpop.f32.mrf.mxu1 }
 0x24d   : > { %v1862_v4 = vadd.f32 %v2955_v63, %v1861_v62 }
 0x24f   : > { %v1876_v6 = vadd.f32 %v1875_v47, %v1862_v4 }
 0x254   : > { %v1863_v2 = vpop.f32.mrf.mxu1  ;;  %v1903_v3 = vpop.f32.mrf.mxu0 }
 0x255   : > { %v1864_v9 = vadd.f32 %v2955_v63, %v1863_v2 }
 0x257   : > { %v1878_v13 = vadd.f32 %v1877_v8, %v1864_v9  ;;  %v1931_v17 = vpop.f32.mrf.mxu2 }
 0x25a   : > { %v1889_v5 = vpop.f32.mrf.mxu3 }
 0x25b   : > { %v1890_v0 = vadd.f32 %v1889_v5, %v1876_v6 }
 0x25c   : > { %v1917_v7 = vpop.f32.mrf.mxu1  ;;  %v1905_v10 = vpop.f32.mrf.mxu0 }
 0x25d   : > { %v1904_v11 = vadd.f32 %v1903_v3, %v1890_v0 }
 0x25f   : > { %v1918_v15 = vadd.f32 %v1917_v7, %v1904_v11  ;;  %v1933_v26 = vpop.f32.mrf.mxu2 }
 0x261   : > { %v1932_v20 = vadd.f32 %v1931_v17, %v1918_v15 }
 0x262   : > { %v1891_v12 = vpop.f32.mrf.mxu3 }
 0x263   : > { %v1892_v16 = vadd.f32 %v1891_v12, %v1878_v13 }
 0x264   : > { %v1919_v14 = vpop.f32.mrf.mxu1  ;;  %v1959_v21 = vpop.f32.mrf.mxu0 }
 0x265   : > { %v1906_v18 = vadd.f32 %v1905_v10, %v1892_v16 }
 0x267   : > { %v1920_v24 = vadd.f32 %v1919_v14, %v1906_v18 }
 0x269   : > { %v1934_v29 = vadd.f32 %v1933_v26, %v1920_v24 }
 0x26a   : > { %v1945_v19 = vpop.f32.mrf.mxu3 }
 0x26b   : > { %v1946_v22 = vadd.f32 %v1945_v19, %v1932_v20 }
 0x26c   : > { %v1973_v23 = vpop.f32.mrf.mxu1  ;;  %v1961_v32 = vpop.f32.mrf.mxu0 }
 0x26d   : > { %v1960_v42 = vadd.f32 %v1959_v21, %v1946_v22 }
 0x26f   : > { %v1974_v25 = vadd.f32 %v1973_v23, %v1960_v42 }
 0x271   : > { %v1978_v28 = vadd.f32 %v2956_v27, %v1974_v25 }
 0x272   : > { %v1947_v30 = vpop.f32.mrf.mxu3 }
 0x273   : > { %v1980_v39 = vmax.f32 %v1978_v28, 0.0  ;;  %v1948_v31 = vadd.f32 %v1947_v30, %v1934_v29 }
 0x274   : > { %v1975_v33 = vpop.f32.mrf.mxu1 }
 0x275   : > { %1982 = vst [vmem:[%s243_s24] sm:$0xff] %v1980_v39  ;;  %v1962_v35 = vadd.f32 %v1961_v32, %v1948_v31 }
 0x277   : > { %v1976_v34 = vadd.f32 %v1975_v33, %v1962_v35 }
 0x279   : > { %v1979_v36 = vadd.f32 %v1976_v34, %v3059_v1 }
 0x27b   : > { %v1981_v61 = vmax.f32 %v1979_v36, 0.0 }
 0x27d   : > { %1983 = vst [vmem:[%s243_s24 + $0x8] sm:$0xff] %v1981_v61 }
 0x27e PF: > { %s16_s18 = sadd.s32 1, %s2997_s18  }
 0x27f   : > { %p13_p7 = scmp.ge.s32.totalorder %s16_s18, 4  }
 0x281   :  { %15 = sbr.rel (!%p13_p7) target bundleno = 1 (0x1), region = 75 }
 0x286   :  { %2006 = vsyncpa [#allocation4], 1 }
 0x287   :  { %2008 = vsyncpa [#allocation4 + $0x1], 1 }

</bundles_post_ra>
